<compile_context>
chip_gen: v7x
topology: tpu7x:2x2x1
jax: 0.10.0
libtpu: 0.0.40
codegen_flags: <defaults>
</compile_context>

<pallas_src>
import functools
import math

import jax
import jax.numpy as jnp
from jax.experimental import pallas as pl
from jax.experimental.pallas import tpu as pltpu


def _pe_add_dropout_kernel(seed_ref, x_ref, pe_ref, o_ref, *,
                           p, training, n_chunks, chunk_cols):
    """One (ts, n_chunks*chunk_cols) tile of out = dropout(x + pe).

    PE is broadcast over the batch by adding it to each 128-aligned
    `chunk_cols`-wide chunk in a static loop (aligned slices; no VMEM temp).
    """
    pe = pe_ref[...]                                   # (ts, chunk_cols)
    apply_dropout = training and p > 0.0
    if apply_dropout:
        # Per-tile seed -> independent dropout masks per grid step (scalar
        # unit only, effectively free).
        i = pl.program_id(0)
        j = pl.program_id(1)
        pltpu.prng_seed(seed_ref[0] + i * pl.num_programs(1) + j)
        # Full-width uint32 threshold compare: keep w.p. (1 - p).
        thresh = jnp.uint32(min(int(p * (1 << 32)), (1 << 32) - 1))
        # NOTE: the dropout mask of partial edge tiles depends on tile shape
        # and does not reproduce PyTorch's RNG stream (still a valid
        # inverted-dropout sample).
        # TODO(synk): for bf16 inputs, draw bits for half the tile and split
        # each uint32 into two 16-bit thresholds to halve PRNG work.

    for r in range(n_chunks):
        lo = r * chunk_cols
        hi = lo + chunk_cols
        val = x_ref[:, lo:hi] + pe                     # 128-aligned static slice
        if apply_dropout:
            bits = pltpu.bitcast(pltpu.prng_random_bits(val.shape), jnp.uint32)
            keep = bits >= thresh
            scale = jnp.asarray(1.0 / (1.0 - p), dtype=val.dtype)
            val = jnp.where(keep, val * scale, jnp.zeros_like(val))
        o_ref[:, lo:hi] = val.astype(o_ref.dtype)


def make_pe_table(d_model, max_len=4096, dtype=jnp.float32):
    """Deterministic sinusoidal table, identical to the PyTorch __init__."""
    position = jnp.arange(max_len, dtype=jnp.float32)[:, None]
    div_term = jnp.exp(
        jnp.arange(0, d_model, 2, dtype=jnp.float32) * (-math.log(10000.0) / d_model))
    pe = jnp.zeros((max_len, d_model), dtype=jnp.float32)
    pe = pe.at[:, 0::2].set(jnp.sin(position * div_term))
    pe = pe.at[:, 1::2].set(jnp.cos(position * div_term))
    return pe[:, None, :].astype(dtype)      # (max_len, 1, d_model)


def _vmem_config():
    """(vmem_limit_bytes, target_tile_bytes) sized per TPU generation."""
    try:
        cap = int(pltpu.get_tpu_info().vmem_capacity_bytes)
    except Exception:
        cap = 64 * 1024 * 1024               # assume smallest (v7x) if unknown
    if cap >= 128 * 1024 * 1024:             # v5e / v6e: plenty of headroom
        return 64 * 1024 * 1024, 8 * 1024 * 1024
    # v7x (64 MiB physical): cap tiles so 2x(x+out+pe) stays well under limit.
    return 40 * 1024 * 1024, 4 * 1024 * 1024


def _choose_tiles(S, B, D, itemsize, target_bytes, max_chunks=16):
    """Pick (row_tile, batch_tile): grow rows first (no unroll cost), then
    batch columns until the x tile reaches ~target_bytes."""
    row_bytes = max(1, D * itemsize)                  # one row, one batch elem
    ts = min(S, max(8, target_bytes // row_bytes))
    if ts < S:
        ts = max(8, (ts // 8) * 8)                    # sublane-aligned
    if D % 128 == 0:
        tb = max(1, min(B, target_bytes // max(1, ts * D * itemsize)))
        tb = min(tb, max_chunks)                      # cap in-kernel unroll
    else:
        tb = B                                        # demo-only fallback path
    return ts, tb


def _ensure_multistep(S, B, D, ts, tb):
    """Guarantee >= 2 grid steps along a parallel axis for non-tiny shapes
    (v7x has 2 TensorCores; a 1-step grid leaves one idle)."""
    if pl.cdiv(S, ts) * pl.cdiv(B, tb) >= 2:
        return ts, tb
    if S >= 16:
        half = (((S + 1) // 2) + 7) // 8 * 8          # sublane-aligned half
        if half < S:
            return half, tb
    if D % 128 == 0 and B >= 2:
        return ts, (B + 1) // 2
    return ts, tb


def positional_encoding(x, pe, *, p=0.1, training=False, seed=0,
                        row_tile=None, batch_tile=None):
    """x: (S, B, D) float; pe: (max_len, 1, D).  Returns dropout(x + pe[:S])."""
    S, B, D = x.shape
    itemsize = jnp.dtype(x.dtype).itemsize
    vmem_limit, target_bytes = _vmem_config()
    ts, tb = _choose_tiles(S, B, D, itemsize, target_bytes)
    if row_tile is None and batch_tile is None:
        ts, tb = _ensure_multistep(S, B, D, ts, tb)
    if row_tile is not None:
        ts = row_tile
    if batch_tile is not None:
        tb = batch_tile
    tile_cols = tb * D

    # Lane-dense view: (S, B*D).  Contiguous reshape -> free in XLA.
    x2 = x.reshape(S, B * D)

    if D % 128 == 0:
        # Main path: PE block is (ts, D); the kernel adds it to every batch
        # chunk.  PE HBM traffic is batch-independent (index_map ignores j).
        pe_in = pe[:S, 0, :].astype(x.dtype)                     # (S, D)
        n_chunks, chunk_cols = tb, D
    else:
        # Tiny / unaligned d_model fallback (e.g. demo D=32): pre-broadcast PE
        # over the (full-batch) lane block on the host.  Never hit for the
        # real d_model=256.
        pe_in = jnp.tile(pe[:S, 0, :].astype(x.dtype), (1, tb))  # (S, tb*D)
        n_chunks, chunk_cols = 1, tile_cols

    seed_arr = jnp.array([seed], dtype=jnp.int32)
    kernel = functools.partial(_pe_add_dropout_kernel, p=p, training=training,
                               n_chunks=n_chunks, chunk_cols=chunk_cols)
    grid = (pl.cdiv(S, ts), pl.cdiv(B, tb))   # batch innermost; keep this order

    out2 = pl.pallas_call(
        kernel,
        out_shape=jax.ShapeDtypeStruct((S, B * D), x.dtype),
        grid_spec=pltpu.PrefetchScalarGridSpec(
            num_scalar_prefetch=1,            # dropout seed lands in SMEM
            grid=grid,
            in_specs=[
                pl.BlockSpec((ts, tile_cols), lambda i, j, seed: (i, j)),
                pl.BlockSpec((ts, chunk_cols), lambda i, j, seed: (i, 0)),
            ],
            out_specs=pl.BlockSpec((ts, tile_cols), lambda i, j, seed: (i, j)),
        ),
        compiler_params=pltpu.CompilerParams(
            dimension_semantics=("parallel", "parallel"),
            vmem_limit_bytes=vmem_limit,
        ),
    )(seed_arr, x2, pe_in)
    return out2.reshape(S, B, D)


if __name__ == "__main__":
    key = jax.random.PRNGKey(0)
    k1, k2 = jax.random.split(key)

    # --- small shape matching the module's seq-first convention (S, B, D) ---
    S, B, D = 8, 2, 32
    x = jax.random.normal(k1, (S, B, D), dtype=jnp.float32)
    pe = make_pe_table(D, max_len=4096)
    out_eval = positional_encoding(x, pe, p=0.3, training=False)
    jax.block_until_ready(out_eval)
    ref = x + pe[:S]
    assert jnp.allclose(out_eval, ref, atol=1e-6), "eval mismatch vs reference"

    # --- 128-aligned path: multi-step grid + 2-chunk in-kernel PE broadcast ---
    S2, B2, D2 = 64, 4, 128
    x_big = jax.random.normal(k2, (S2, B2, D2), dtype=jnp.float32)
    pe_big = make_pe_table(D2, max_len=4096)
    out_big = positional_encoding(x_big, pe_big, p=0.3, training=False,
                                  row_tile=16, batch_tile=2)     # grid = (4, 2)
    jax.block_until_ready(out_big)
    ref_big = x_big + pe_big[:S2]
    assert jnp.allclose(out_big, ref_big, atol=1e-6), "tiled eval mismatch"

    # --- automatic generation-aware tile selection (exercises multi-step) ---
    out_auto = positional_encoding(x_big, pe_big, p=0.3, training=False)
    jax.block_until_ready(out_auto)
    assert jnp.allclose(out_auto, ref_big, atol=1e-6), "auto-tile eval mismatch"

    # --- training-mode dropout uses the on-chip TPU PRNG (TPU backend only) ---
    if jax.devices()[0].platform == "tpu":
        p_drop = 0.3
        out_tr = positional_encoding(x_big, pe_big, p=p_drop, training=True,
                                     seed=1234, row_tile=16, batch_tile=2)
        jax.block_until_ready(out_tr)
        scaled = ref_big / (1.0 - p_drop)
        ok = jnp.all(jnp.isclose(out_tr, 0.0)
                     | jnp.isclose(out_tr, scaled, atol=1e-5))
        assert bool(ok), "training-mode dropout values inconsistent"

    print("KERNEL_OK")
</pallas_src>

<mosaic_0001>
module attributes {stable_mosaic.version = 11 : i64} {
  func.func @_pe_add_dropout_kernel(%arg0: i32, %arg1: i32, %arg2: memref<1xi32, #tpu.memory_space<smem>>, %arg3: memref<8x64xf32, #tpu.memory_space<vmem>>, %arg4: memref<8x64xf32, #tpu.memory_space<vmem>>, %arg5: memref<8x64xf32, #tpu.memory_space<vmem>>) attributes {dimension_semantics = [#tpu.dimension_semantics<parallel>, #tpu.dimension_semantics<parallel>], iteration_bounds = array<i64: 1, 1>, scalar_prefetch = 1 : i64, scratch_operands = 0 : i64, tpu.core_type = #tpu.core_type<tc>, window_params = [{transform_indices = @transform_0, window_bounds = array<i64: 8, 64>}, {transform_indices = @transform_1, window_bounds = array<i64: 8, 64>}, {transform_indices = @transform_2, window_bounds = array<i64: 8, 64>}]} {
    %c0 = arith.constant 0 : index
    %c0_0 = arith.constant 0 : index
    %0 = vector.load %arg4[%c0, %c0_0] : memref<8x64xf32, #tpu.memory_space<vmem>>, vector<8x64xf32>
    %c0_1 = arith.constant 0 : index
    %c0_2 = arith.constant 0 : index
    %1 = vector.load %arg3[%c0_1, %c0_2] : memref<8x64xf32, #tpu.memory_space<vmem>>, vector<8x64xf32>
    %2 = arith.addf %1, %0 : vector<8x64xf32>
    %c0_3 = arith.constant 0 : index
    %c0_4 = arith.constant 0 : index
    %3 = vector.load %arg5[%c0_3, %c0_4] : memref<8x64xf32, #tpu.memory_space<vmem>>, vector<8x64xf32>
    tpu.vector_store %arg5[%c0_3, %c0_4], %2 {strides = array<i32>} : memref<8x64xf32, #tpu.memory_space<vmem>>, vector<8x64xf32>,
    return
  }
  func.func @transform_0(%arg0: i32, %arg1: i32, %arg2: memref<1xi32, #tpu.memory_space<smem>>) -> (i32, i32) {
    %c0_i32 = arith.constant 0 : i32
    return %arg0, %arg1 : i32, i32
  }
  func.func @transform_1(%arg0: i32, %arg1: i32, %arg2: memref<1xi32, #tpu.memory_space<smem>>) -> (i32, i32) {
    %c0_i32 = arith.constant 0 : i32
    %c0_i32_0 = arith.constant 0 : i32
    return %arg0, %c0_i32 : i32, i32
  }
  func.func @transform_2(%arg0: i32, %arg1: i32, %arg2: memref<1xi32, #tpu.memory_space<smem>>) -> (i32, i32) {
    %c0_i32 = arith.constant 0 : i32
    return %arg0, %arg1 : i32, i32
  }
}

</mosaic_0001>

<bundles_post_ra>
// kernel: tpu_custom_call.1
= control target key start
LH: loop header
LB: loop body
LE: loop exit
PB: predicated region body
PF: predicated region fallthrough
CT: control target
= control target key end

     0   :  { %9 = vsyncpa [#allocation5], 0  ;;  %s193_s0 = inlined_call_operand.<no memory space> [shape: s32[1], index: 0, kind: input, shape index: {}]   ;;  %s194_s1 = inlined_call_operand.hbm [shape: f32[8,64], index: 1, kind: input, shape index: {}]   ;;  %s195_s2 = inlined_call_operand.hbm [shape: f32[8,64], index: 2, kind: input, shape index: {}]   ;;  %s196_s3 = inlined_call_operand.hbm [shape: f32[8,64], index: 3, kind: output, shape index: {}]  }
   0x1   :  { %10 = vsyncpa [#allocation8], 0 }
   0x2   :  { %11 = vsyncpa [#allocation6], 0  ;;  %s134_s12 = smov [#allocation4]   ;;  %s135_s14 = smov [#allocation7]  }
   0x3   :  { %s18_s13 = sshll.u32 %s134_s12, 4  ;;  %s28_s15 = sshll.u32 %s135_s14, 4  ;;  %s19_s13 = int_to_ptr.vmem [resolvable:$true] %s18_s13  ;;  %s29_s15 = int_to_ptr.vmem [resolvable:$true] %s28_s15 }
   0x4   :  { %s62_s17 = scalar_lea.hbm %s194_s1, 128 }
   0x5   :  { %p63_p0 = scmp.ne.s32.totalorder %s194_s1, %s62_s17  ;;  %p66_p1 = scmp.lt.u32.totalorder %s62_s17, %s194_s1 }
   0x7   :  { %p68_p2 = pnand %p66_p1, %p63_p0 }
   0x9   :  { %71 = shalt.err (!%p68_p2)
}
   0xa   :  { %s72_s22 = scalar_lea.vmem %s19_s13, 128  ;;  %p77_p4 = scmp.lt.s32.totalorder %s19_s13, %s19_s13 }
   0xb   :  { %p73_p3 = scmp.ne.s32.totalorder %s19_s13, %s72_s22  ;;  %p78_p5 = scmp.lt.s32.totalorder %s72_s22, %s72_s22 }
   0xd   :  { %p79_p6 = por %p78_p5, %p77_p4 }
   0xf   :  { %p80_p7 = pnand %p79_p6, %p73_p3 }
  0x11   :  { %83 = shalt.err (!%p80_p7)
}
  0x12   :  { %21 = dma.hbm_to_vmem [thread:$0]  %s194_s1, 128, %s19_s13, [#allocation5]  }
  0x13   :  { %s84_s27 = scalar_lea.hbm %s195_s2, 128 }
  0x14   :  { %p85_p8 = scmp.ne.s32.totalorder %s195_s2, %s84_s27  ;;  %p88_p9 = scmp.lt.u32.totalorder %s84_s27, %s195_s2 }
  0x16   :  { %p90_p10 = pnand %p88_p9, %p85_p8 }
  0x18   :  { %93 = shalt.err (!%p90_p10)
}
  0x19   :  { %s94_s5 = scalar_lea.vmem %s29_s15, 128  ;;  %p99_p12 = scmp.lt.s32.totalorder %s29_s15, %s29_s15 }
  0x1a   :  { %p95_p11 = scmp.ne.s32.totalorder %s29_s15, %s94_s5  ;;  %p100_p13 = scmp.lt.s32.totalorder %s94_s5, %s94_s5 }
  0x1c   :  { %p101_p0 = por %p100_p13, %p99_p12 }
  0x1e   :  { %p102_p1 = pnand %p101_p0, %p95_p11 }
  0x20   :  { %105 = shalt.err (!%p102_p1)
}
  0x21   :  { %31 = dma.hbm_to_vmem [thread:$0]  %s195_s2, 128, %s29_s15, [#allocation8]  }
  0x22   :  { %128 = dma.done.wait [#allocation5], 128  }
  0x23   :  { %129 = vsyncadd [#allocation5], 4294967168 }
  0x24   :  { %130 = dma.done.wait [#allocation8], 128  }
  0x25   :  { %131 = vsyncadd [#allocation8], 4294967168  ;;  %s136_s7 = smov [#allocation9]   ;;  %v38_v0 = vld [vmem:[#allocation7] sm:$0xff]  ;;  %v39_v1 = vld [vmem:[#allocation4] sm:$0xff]  ;;  %vm41_vm0 = vcmask 523264  }
  0x26   :  { %s49_s8 = sshll.u32 %s136_s7, 4  ;;  %v40_v2 = vadd.f32 %v39_v1, %v38_v0  ;;  %s50_s8 = int_to_ptr.vmem [resolvable:$true] %s49_s8 }
  0x27   :  { %s106_s9 = scalar_lea.vmem %s50_s8, 128  ;;  %p111_p3 = scmp.lt.s32.totalorder %s50_s8, %s50_s8 }
  0x28   :  { %42 = vst.msk [vmem:[#allocation9] sm:$0xff] %vm41_vm0, %v40_v2  ;;  %p107_p2 = scmp.ne.s32.totalorder %s50_s8, %s106_s9  ;;  %p112_p4 = scmp.lt.s32.totalorder %s106_s9, %s106_s9 }
  0x2a   :  { %p113_p5 = por %p112_p4, %p111_p3 }
  0x2c   :  { %p114_p6 = pnand %p113_p5, %p107_p2 }
  0x2e   :  { %117 = shalt.err (!%p114_p6)
}
  0x2f   :  { %s118_s11 = scalar_lea.hbm %s196_s3, 128 }
  0x30   :  { %p119_p7 = scmp.ne.s32.totalorder %s196_s3, %s118_s11  ;;  %p122_p8 = scmp.lt.u32.totalorder %s118_s11, %s196_s3 }
  0x32   :  { %p124_p9 = pnand %p122_p8, %p119_p7 }
  0x34   :  { %127 = shalt.err (!%p124_p9)
}
  0x35   :  { %52 = dma.vmem_to_hbm [thread:$0]  %s50_s8, 128, %s196_s3, [#allocation6]  }
  0x36   :  { %132 = dma.done.wait [#allocation6], 128  }
  0x37   :  { %133 = vsyncadd [#allocation6], 4294967168 }
  0x38   :  { %56 = vsyncpa [#allocation5], 1 }
  0x39   :  { %57 = vsyncpa [#allocation8], 1 }
  0x3a   :  { %58 = vsyncpa [#allocation6], 1 }

</bundles_post_ra>
